<compile_context>
chip_gen: v6e
topology: v6e:2x2x1
jax: 0.10.0
libtpu: 0.0.40
codegen_flags: <defaults>
</compile_context>

<pallas_src>
import functools
import math

import jax
import jax.numpy as jnp
from jax.experimental import pallas as pl
from jax.experimental.pallas import tpu as pltpu


# ----------------------------------------------------------------------------
# Generation-aware sizing (v5e/v6e: 128 MiB VMEM, v7x: 64 MiB)
# ----------------------------------------------------------------------------
def _tpu_vmem_capacity_bytes():
    try:
        cap = getattr(pltpu.get_tpu_info(), "vmem_capacity_bytes", None)
        if cap:
            return int(cap)
    except Exception:
        pass
    return 64 * 1024 * 1024        # conservative fallback (safe on v7x)


_VMEM_CAP = _tpu_vmem_capacity_bytes()
# Request ~3/4 of physical VMEM, capped at 96 MiB (v5e/v6e -> 96 MiB, v7x -> 48 MiB).
VMEM_LIMIT_BYTES = min((_VMEM_CAP * 3) // 4, 96 * 1024 * 1024)
_BIG_VMEM = VMEM_LIMIT_BYTES >= 64 * 1024 * 1024

# Matmul tile targets: multiples of 256 (v6e/v7x 2x256^2 MXU) and of 128
# (v5e 4x128^2 MXU).
TM = 512 if _BIG_VMEM else 256
TN = 256
TK = 512
LN_ROWS = 2048 if _BIG_VMEM else 1024
CE_BLOCK_BYTES = (12 if _BIG_VMEM else 6) * 1024 * 1024


def _round_up(x, m):
    return (x + m - 1) // m * m


def _pad2(x, rows, cols, value=0):
    r, c = x.shape
    if r == rows and c == cols:
        return x
    return jnp.pad(x, ((0, rows - r), (0, cols - c)), constant_values=value)


def _pad_axis0(x, n):
    if x.shape[0] == n:
        return x
    pad = [(0, n - x.shape[0])] + [(0, 0)] * (x.ndim - 1)
    return jnp.pad(x, pad)


def _cparams(dims):
    return pltpu.CompilerParams(dimension_semantics=dims,
                                vmem_limit_bytes=VMEM_LIMIT_BYTES)


def _apply_act(y, act):
    if act == "relu":
        return jnp.maximum(y, 0.0)
    if act == "gelu":
        # TODO(synk): tanh-approx GELU (PyTorch nn.GELU default is erf-based).
        return 0.5 * y * (1.0 + jnp.tanh(0.7978845608028654 *
                                         (y + 0.044715 * y * y * y)))
    return y


def _ln_math(y, g, b, eps):
    mu = jnp.mean(y, axis=-1, keepdims=True)
    var = jnp.mean((y - mu) * (y - mu), axis=-1, keepdims=True)
    return (y - mu) * jax.lax.rsqrt(var + eps) * g + b


# ----------------------------------------------------------------------------
# Parameter prep: pad + cast ONCE (review item #1).  Raw f32 masters are kept
# separately for the momentum blend.
# ----------------------------------------------------------------------------
def prep_linear(raw):
    w, b = raw["w"], raw["b"]
    K, N = w.shape
    Kp = K if K <= TK else _round_up(K, TK)
    Np = N if N <= TN else _round_up(N, TN)
    return {"w": _pad2(w, Kp, Np).astype(jnp.bfloat16),
            "b": _pad2(b.reshape(1, N).astype(jnp.float32), 1, Np),
            "k": K, "n": N}


def prep_ln(raw):
    return {"g": raw["g"].reshape(1, -1).astype(jnp.float32),
            "b": raw["b"].reshape(1, -1).astype(jnp.float32)}


def prep_tlayer(raw):
    return {"qkv": prep_linear(raw["qkv"]), "o": prep_linear(raw["o"]),
            "ln1": prep_ln(raw["ln1"]), "ff1": prep_linear(raw["ff1"]),
            "ff2": prep_linear(raw["ff2"]), "ln2": prep_ln(raw["ln2"])}


def prep_video_encoder(raw):
    return {"proj": prep_linear(raw["proj"]),
            "pos": raw["pos"].astype(jnp.bfloat16),
            "ln": prep_ln(raw["ln"]),
            "layer": prep_tlayer(raw["layer"])}


def prep_projection_head(raw):
    return {"l1": prep_linear(raw["l1"]), "l2": prep_linear(raw["l2"])}


def prep_embeddings(raw):
    return {"word": raw["word"].astype(jnp.bfloat16),
            "type": raw["type"].astype(jnp.bfloat16),
            "pos": raw["pos"].astype(jnp.bfloat16),
            "ln": prep_ln(raw["ln"])}


def prep_pred_head(raw):
    return {"transform": prep_linear(raw["transform"]), "ln": prep_ln(raw["ln"]),
            "decoder": prep_linear(raw["decoder"])}


def prep_all(raw):
    return {"video_encoder": prep_video_encoder(raw["video_encoder"]),
            "proj_q": prep_projection_head(raw["proj_q"]),
            "emb_dec": prep_embeddings(raw["emb_dec"]),
            "decoder": prep_tlayer(raw["decoder"]),
            "pred_head": prep_pred_head(raw["pred_head"])}


# ----------------------------------------------------------------------------
# Fused linear (+bias, +ReLU/GELU): tiled, bf16 in / f32 accumulate, bf16 out
# ----------------------------------------------------------------------------
def _linear_kernel(x_ref, w_ref, b_ref, o_ref, acc_ref, *, act):
    @pl.when(pl.program_id(2) == 0)
    def _():
        acc_ref[...] = jnp.zeros_like(acc_ref)

    acc_ref[...] += jnp.dot(x_ref[...], w_ref[...],
                            preferred_element_type=jnp.float32)

    @pl.when(pl.program_id(2) == pl.num_programs(2) - 1)
    def _():
        y = _apply_act(acc_ref[...] + b_ref[...], act)
        o_ref[...] = y.astype(o_ref.dtype)


def _linear_tiles(p, M):
    Kp, Np = p["w"].shape
    bk = Kp if Kp <= TK else TK
    bn = Np if Np <= TN else TN
    bm = min(TM, _round_up(M, 8))
    # v7x megacore: ensure >=2 "parallel" grid points whenever possible.
    if (_round_up(M, bm) // bm) * (Np // bn) < 2 and bm >= 16:
        bm = _round_up(bm // 2, 8)
    Mp = _round_up(M, bm)
    return bm, bn, bk, Mp, Np, Kp


def pallas_linear(p, x, act="none", out_dtype=jnp.bfloat16):
    """act(x @ w + b). Weights pre-padded/bf16 in `p`; x cast to bf16 if needed."""
    M = x.shape[0]
    N = p["n"]
    if x.dtype != jnp.bfloat16:
        x = x.astype(jnp.bfloat16)
    bm, bn, bk, Mp, Np, Kp = _linear_tiles(p, M)
    xp = _pad2(x, Mp, Kp)                     # no-op unless M/K need padding

    # TODO(synk): for the V-wide decoder weight stream, sweep
    #             pipeline_mode=pl.Buffered(3) on the w spec if the profile
    #             shows exposed DMA waits on the k/j axes.
    out = pl.pallas_call(
        functools.partial(_linear_kernel, act=act),
        grid=(Mp // bm, Np // bn, Kp // bk),
        in_specs=[
            pl.BlockSpec((bm, bk), lambda i, j, k: (i, k)),
            pl.BlockSpec((bk, bn), lambda i, j, k: (k, j)),
            pl.BlockSpec((1, bn), lambda i, j, k: (0, j)),
        ],
        out_specs=pl.BlockSpec((bm, bn), lambda i, j, k: (i, j)),
        out_shape=jax.ShapeDtypeStruct((Mp, Np), out_dtype),
        scratch_shapes=[pltpu.VMEM((bm, bn), jnp.float32)],
        compiler_params=_cparams(("parallel", "parallel", "arbitrary")),
    )(xp, p["w"], p["b"])
    if Mp != M or Np != N:
        out = out[:M, :N]
    return out


# ----------------------------------------------------------------------------
# Linear with LayerNorm (+ optional residual) fused into the matmul epilogue.
# Requires the output width to fit one tile column (bn == N, no N padding).
# ----------------------------------------------------------------------------
def _linear_ln_kernel(x_ref, w_ref, b_ref, g_ref, bb_ref, o_ref, acc_ref, *,
                      act, eps):
    @pl.when(pl.program_id(2) == 0)
    def _():
        acc_ref[...] = jnp.zeros_like(acc_ref)

    acc_ref[...] += jnp.dot(x_ref[...], w_ref[...],
                            preferred_element_type=jnp.float32)

    @pl.when(pl.program_id(2) == pl.num_programs(2) - 1)
    def _():
        y = _apply_act(acc_ref[...] + b_ref[...], act)
        o_ref[...] = _ln_math(y, g_ref[...], bb_ref[...], eps).astype(o_ref.dtype)


def _linear_ln_res_kernel(x_ref, w_ref, b_ref, r_ref, g_ref, bb_ref, o_ref,
                          acc_ref, *, act, eps):
    @pl.when(pl.program_id(2) == 0)
    def _():
        acc_ref[...] = jnp.zeros_like(acc_ref)

    acc_ref[...] += jnp.dot(x_ref[...], w_ref[...],
                            preferred_element_type=jnp.float32)

    @pl.when(pl.program_id(2) == pl.num_programs(2) - 1)
    def _():
        y = _apply_act(acc_ref[...] + b_ref[...], act)
        y = y + r_ref[...].astype(jnp.float32)
        o_ref[...] = _ln_math(y, g_ref[...], bb_ref[...], eps).astype(o_ref.dtype)


def pallas_linear_ln(p, x, ln, residual=None, act="none",
                     out_dtype=jnp.bfloat16, eps=1e-12):
    """LayerNorm(act(x @ w + b) [+ residual]) with LN fused into the epilogue."""
    M = x.shape[0]
    N = p["n"]
    Kp, Np = p["w"].shape
    if Np != N or N > 2048:        # LN needs the exact, unpadded row in one tile
        y = pallas_linear(p, x, act=act, out_dtype=jnp.float32)
        return pallas_layernorm(ln, y, residual=residual,
                                out_dtype=out_dtype, eps=eps)

    if x.dtype != jnp.bfloat16:
        x = x.astype(jnp.bfloat16)
    bk = Kp if Kp <= TK else TK
    bn = Np
    bm = min(TM, _round_up(M, 8))
    bm = min(bm, max(8, ((8 * 1024 * 1024) // (4 * bn)) // 8 * 8))
    if _round_up(M, bm) // bm < 2 and bm >= 16:
        bm = _round_up(bm // 2, 8)
    Mp = _round_up(M, bm)
    xp = _pad2(x, Mp, Kp)

    x_spec = pl.BlockSpec((bm, bk), lambda i, j, k: (i, k))
    w_spec = pl.BlockSpec((bk, bn), lambda i, j, k: (k, j))
    vec_spec = pl.BlockSpec((1, bn), lambda i, j, k: (0, j))
    row_spec = pl.BlockSpec((bm, bn), lambda i, j, k: (i, j))

    if residual is None:
        kernel = functools.partial(_linear_ln_kernel, act=act, eps=eps)
        in_specs = [x_spec, w_spec, vec_spec, vec_spec, vec_spec]
        args = (xp, p["w"], p["b"], ln["g"], ln["b"])
    else:
        rp = _pad2(residual, Mp, Np)
        kernel = functools.partial(_linear_ln_res_kernel, act=act, eps=eps)
        in_specs = [x_spec, w_spec, vec_spec, row_spec, vec_spec, vec_spec]
        args = (xp, p["w"], p["b"], rp, ln["g"], ln["b"])

    out = pl.pallas_call(
        kernel,
        grid=(Mp // bm, 1, Kp // bk),
        in_specs=in_specs,
        out_specs=row_spec,
        out_shape=jax.ShapeDtypeStruct((Mp, Np), out_dtype),
        scratch_shapes=[pltpu.VMEM((bm, bn), jnp.float32)],
        compiler_params=_cparams(("parallel", "parallel", "arbitrary")),
    )(*args)
    return out[:M] if Mp != M else out


# ----------------------------------------------------------------------------
# Standalone LayerNorm (row-tiled) with optional fused residual add
# ----------------------------------------------------------------------------
def _ln_kernel(x_ref, g_ref, b_ref, o_ref, *, eps):
    x = x_ref[...].astype(jnp.float32)
    o_ref[...] = _ln_math(x, g_ref[...], b_ref[...], eps).astype(o_ref.dtype)


def _ln_res_kernel(x_ref, r_ref, g_ref, b_ref, o_ref, *, eps):
    x = x_ref[...].astype(jnp.float32) + r_ref[...].astype(jnp.float32)
    o_ref[...] = _ln_math(x, g_ref[...], b_ref[...], eps).astype(o_ref.dtype)


def pallas_layernorm(ln, x, residual=None, out_dtype=jnp.bfloat16, eps=1e-12):
    M, D = x.shape
    bm = min(LN_ROWS, _round_up(M, 8))
    if _round_up(M, bm) // bm < 2 and bm >= 16:
        bm = _round_up(bm // 2, 8)
    Mp = _round_up(M, bm)
    xp = _pad2(x, Mp, D)

    row_spec = pl.BlockSpec((bm, D), lambda i: (i, 0))
    vec_spec = pl.BlockSpec((1, D), lambda i: (0, 0))
    if residual is None:
        kernel = functools.partial(_ln_kernel, eps=eps)
        in_specs = [row_spec, vec_spec, vec_spec]
        args = (xp, ln["g"], ln["b"])
    else:
        kernel = functools.partial(_ln_res_kernel, eps=eps)
        in_specs = [row_spec, row_spec, vec_spec, vec_spec]
        args = (xp, _pad2(residual, Mp, D), ln["g"], ln["b"])

    out = pl.pallas_call(
        kernel,
        grid=(Mp // bm,),
        in_specs=in_specs,
        out_specs=row_spec,
        out_shape=jax.ShapeDtypeStruct((Mp, D), out_dtype),
        compiler_params=_cparams(("parallel",)),
    )(*args)
    return out[:M] if Mp != M else out


# ----------------------------------------------------------------------------
# Multi-head self-attention: batched over (batch*head) slabs, bf16 in/out
# ----------------------------------------------------------------------------
def _mha_kernel(q_ref, k_ref, v_ref, bias_ref, o_ref, *, scale):
    q = q_ref[...]                                        # (g, L, dh) bf16
    k = k_ref[...]
    v = v_ref[...]
    s = jnp.einsum("gqd,gkd->gqk", q, k,
                   preferred_element_type=jnp.float32) * scale + bias_ref[...]
    s = s - jnp.max(s, axis=-1, keepdims=True)
    e = jnp.exp(s)
    p = e * pl.reciprocal(jnp.sum(e, axis=-1, keepdims=True), approx=True)
    o = jnp.einsum("gqk,gkd->gqd", p.astype(v.dtype), v,
                   preferred_element_type=jnp.float32)
    o_ref[...] = o.astype(o_ref.dtype)


def pallas_mha(qkv, mask, num_heads, scale):
    """qkv: [B, L, 3D] bf16 packed projections; mask: [B, L] (1 = keep key).

    Head split/merge is a single fused XLA reshape/transpose around the
    batched-head Pallas kernel.
    TODO(synk): if the reference decoder uses a 2-D / causal (shifted) mask,
                thread that mask through here instead of the key mask.
    """
    B, L, threeD = qkv.shape
    D = threeD // 3
    dh = D // num_heads
    G = B * num_heads

    qkvh = qkv.reshape(B, L, 3, num_heads, dh).transpose(2, 0, 3, 1, 4)
    q = qkvh[0].reshape(G, L, dh)
    k = qkvh[1].reshape(G, L, dh)
    v = qkvh[2].reshape(G, L, dh)
    bias = jnp.where(mask > 0.5, 0.0, -1e9).astype(jnp.float32)       # (B, L)
    bias = jnp.broadcast_to(bias[:, None, None, :],
                            (B, num_heads, 1, L)).reshape(G, 1, L)

    gt = max(1, min(G, (2 * 1024 * 1024) // max(1, L * L * 4)))
    if _round_up(G, gt) // gt < 2 and gt >= 2:     # keep both v7x TCs busy
        gt = (gt + 1) // 2
    Gp = _round_up(G, gt)
    q, k, v, bias = (_pad_axis0(q, Gp), _pad_axis0(k, Gp),
                     _pad_axis0(v, Gp), _pad_axis0(bias, Gp))

    out = pl.pallas_call(
        functools.partial(_mha_kernel, scale=scale),
        grid=(Gp // gt,),
        in_specs=[
            pl.BlockSpec((gt, L, dh), lambda g: (g, 0, 0)),
            pl.BlockSpec((gt, L, dh), lambda g: (g, 0, 0)),
            pl.BlockSpec((gt, L, dh), lambda g: (g, 0, 0)),
            pl.BlockSpec((gt, 1, L), lambda g: (g, 0, 0)),
        ],
        out_specs=pl.BlockSpec((gt, L, dh), lambda g: (g, 0, 0)),
        out_shape=jax.ShapeDtypeStruct((Gp, L, dh), jnp.bfloat16),
        compiler_params=_cparams(("parallel",)),
    )(q, k, v, bias)

    out = out[:G].reshape(B, num_heads, L, dh).transpose(0, 2, 1, 3)
    return out.reshape(B, L, D)


# ----------------------------------------------------------------------------
# Masked cross-entropy (ignore_index = -1): per-tile partial sums ("parallel")
# ----------------------------------------------------------------------------
def _ce_kernel(logits_ref, labels_ref, sum_ref, cnt_ref):
    lg = logits_ref[...].astype(jnp.float32)              # (bm, V)
    lbl = labels_ref[...]                                 # (bm, 1) int32
    m = jnp.max(lg, axis=-1, keepdims=True)
    lse = jnp.log(jnp.sum(jnp.exp(lg - m), axis=-1, keepdims=True)) + m
    col = jax.lax.broadcasted_iota(jnp.int32, lg.shape, 1)
    onehot = (col == lbl).astype(jnp.float32)
    tgt = jnp.sum(lg * onehot, axis=-1, keepdims=True)
    valid = (lbl >= 0).astype(jnp.float32)
    sum_ref[0, 0] = jnp.sum((lse - tgt) * valid)
    cnt_ref[0, 0] = jnp.sum(valid)


def pallas_cross_entropy(logits, labels):
    """Mean NLL over labels != -1 (nn.CrossEntropyLoss(ignore_index=-1))."""
    N, V = logits.shape
    bm_cap = max(8, (CE_BLOCK_BYTES // (logits.dtype.itemsize * V)) // 8 * 8)
    bm = max(8, min(bm_cap, _round_up(N, 8)))
    if _round_up(N, bm) // bm < 2 and bm >= 16:            # megacore friendly
        bm = _round_up(bm // 2, 8)
    Npad = _round_up(N, bm)
    T = Npad // bm
    lp = _pad2(logits, Npad, V)
    lb = _pad2(labels.reshape(N, 1).astype(jnp.int32), Npad, 1, value=-1)

    s, c = pl.pallas_call(
        _ce_kernel,
        grid=(T,),
        in_specs=[
            pl.BlockSpec((bm, V), lambda i: (i, 0)),
            pl.BlockSpec((bm, 1), lambda i: (i, 0)),
        ],
        out_specs=[
            pl.BlockSpec((1, 1), lambda i: (i, 0),
                         memory_space=pltpu.MemorySpace.SMEM),
            pl.BlockSpec((1, 1), lambda i: (i, 0),
                         memory_space=pltpu.MemorySpace.SMEM),
        ],
        out_shape=[
            jax.ShapeDtypeStruct((T, 1), jnp.float32),
            jax.ShapeDtypeStruct((T, 1), jnp.float32),
        ],
        compiler_params=_cparams(("parallel",)),
    )(lp, lb)
    return jnp.sum(s) / jnp.maximum(jnp.sum(c), 1.0)


# ----------------------------------------------------------------------------
# Model building blocks (parameter plumbing in plain JAX, math in Pallas)
# ----------------------------------------------------------------------------
def transformer_layer(p, x, mask, num_heads):
    """One BERT-style self-attention + FFN block with post-LN residuals."""
    B, L, D = x.shape
    x2 = x.reshape(B * L, D)                               # bf16
    # Fused QKV projection (one MXU pass, one HBM read of x2), bf16 out.
    qkv = pallas_linear(p["qkv"], x2, out_dtype=jnp.bfloat16)
    ctx = pallas_mha(qkv.reshape(B, L, 3 * D), mask, num_heads,
                     1.0 / math.sqrt(D // num_heads))      # (B, L, D) bf16
    # O-projection with residual + LayerNorm fused in the epilogue.
    h = pallas_linear_ln(p["o"], ctx.reshape(B * L, D), p["ln1"], residual=x2)
    ff = pallas_linear(p["ff1"], h, act="gelu", out_dtype=jnp.bfloat16)
    # FFN output projection with residual + LayerNorm fused.
    out = pallas_linear_ln(p["ff2"], ff, p["ln2"], residual=h)
    return out.reshape(B, L, D)
    # TODO(synk): at demo scale (D=32, L=16) the whole layer fits VMEM; the
    #             per-op pallas_calls could be collapsed into one kernel.


def video_encoder(p, feats, mask, num_heads):
    B, Lv, Fv = feats.shape
    D = p["pos"].shape[-1]
    x = pallas_linear(p["proj"], feats.reshape(B * Lv, Fv),
                      out_dtype=jnp.bfloat16).reshape(B, Lv, D)
    x = x + p["pos"]                                       # bf16 + bf16
    x = pallas_layernorm(p["ln"], x.reshape(B * Lv, D), out_dtype=jnp.bfloat16)
    return transformer_layer(p["layer"], x.reshape(B, Lv, D), mask, num_heads)


def projection_head(p, x):
    B, L, D = x.shape
    h = pallas_linear(p["l1"], x.reshape(B * L, D), act="relu",
                      out_dtype=jnp.bfloat16)
    h = pallas_linear(p["l2"], h, out_dtype=jnp.float32)   # f32 for the MSE loss
    return h.reshape(B, L, D)


def embeddings_with_video(p, input_ids, token_type_ids, video_embeddings,
                          max_v_len):
    B, L = input_ids.shape
    D = p["word"].shape[-1]
    word = jnp.take(p["word"], input_ids, axis=0)          # glue: gather (bf16)
    typ = jnp.take(p["type"], token_type_ids, axis=0)
    tok = jnp.concatenate([video_embeddings, word[:, max_v_len:, :]], axis=1)
    x = tok + typ + p["pos"]
    out = pallas_layernorm(p["ln"], x.reshape(B * L, D), out_dtype=jnp.bfloat16)
    return out.reshape(B, L, D)


def pred_head(p, x):
    B, L, D = x.shape
    # dense -> GELU -> LayerNorm fused into one kernel.
    h = pallas_linear_ln(p["transform"], x.reshape(B * L, D), p["ln"], act="gelu")
    # bf16 logits (halves the CE HBM read at real vocab sizes).
    logits = pallas_linear(p["decoder"], h, out_dtype=jnp.bfloat16)
    return logits.reshape(B, L, -1)


def momentum_update(q_params, k_params, m):
    # param_k = m * param_k + (1 - m) * param_q on the raw f32 masters
    # (functional analogue of Reasoner._momentum_update_aux_encoder).
    return jax.tree_util.tree_map(lambda pk, pq: pk * m + pq * (1.0 - m),
                                  k_params, q_params)


# ----------------------------------------------------------------------------
# Reasoner forward (K == 1, disable_scheduled_sampling == True)
# ----------------------------------------------------------------------------
def reasoner_forward(prepped, raw, cfg, video_feats, video_mask,
                     unmasked_video_feats, unmasked_video_mask,
                     input_ids, token_type_ids, input_masks, input_labels):
    H = cfg["num_attention_heads"]
    Lv = cfg["max_v_len"]

    # --- query branch (pre-prepped bf16 weights) ---
    video_embeddings = video_encoder(prepped["video_encoder"], video_feats,
                                     video_mask, H)
    _video_embeddings = projection_head(prepped["proj_q"], video_embeddings)

    # --- momentum (key) branch, no grad: blend f32 masters, then prep (the
    #     bf16 cast fuses with the blend; unavoidable per-call since the
    #     blended weights change every step) ---
    enc_aux = prep_video_encoder(
        momentum_update(raw["video_encoder"], raw["video_encoder_aux"],
                        cfg["momentum_aux_m"]))
    proj_k = prep_projection_head(
        momentum_update(raw["proj_q"], raw["proj_k"], cfg["momentum_aux_m"]))
    unmasked_video_embeddings = video_encoder(enc_aux, unmasked_video_feats,
                                              unmasked_video_mask, H)
    _unmasked = projection_head(proj_k, unmasked_video_embeddings)
    _unmasked = jax.lax.stop_gradient(_unmasked * unmasked_video_mask[..., None])

    # MSE "sum" loss stays in plain JAX so XLA fuses mask-mul + sub + reduce.
    _ve = _video_embeddings * unmasked_video_mask[..., None]
    mse = jnp.sum((_ve - _unmasked) ** 2)
    aux_loss = cfg["loss_aux_weight"] * mse / jax.lax.stop_gradient(
        jnp.sum(unmasked_video_mask))
    caption_loss = aux_loss

    # --- dec1 pass (K == 1, scheduled sampling disabled) ---
    emb = embeddings_with_video(prepped["emb_dec"], input_ids, token_type_ids,
                                video_embeddings, Lv)
    dec_out = transformer_layer(prepped["decoder"], emb, input_masks, H)
    scores = pred_head(prepped["pred_head"], dec_out)

    ce = pallas_cross_entropy(scores.reshape(-1, cfg["vocab_size"]),
                              input_labels.reshape(-1))
    caption_loss = caption_loss + cfg["loss_main_caption"] * ce

    prediction_scores_list = scores.reshape(1, *scores.shape)   # S = 1
    return caption_loss, prediction_scores_list


# ----------------------------------------------------------------------------
# Deterministic raw (f32 master) parameter init: N(0, 0.02), zero bias
# ----------------------------------------------------------------------------
def init_params(key, cfg):
    D = cfg["hidden_size"]
    V = cfg["vocab_size"]
    Fv = cfg["video_feature_size"]
    I = cfg["intermediate_size"]
    Lv = cfg["max_v_len"]
    L = Lv + cfg["max_t_len"]
    std = cfg["initializer_range"]
    keys = iter(jax.random.split(key, 64))

    def lin(din, dout):
        return {"w": jax.random.normal(next(keys), (din, dout), jnp.float32) * std,
                "b": jnp.zeros((dout,), jnp.float32)}

    def ln(d):
        return {"g": jnp.ones((d,), jnp.float32), "b": jnp.zeros((d,), jnp.float32)}

    def tlayer():
        # q/k/v stored fused as one [D, 3D] projection (same math, one matmul).
        return {"qkv": lin(D, 3 * D), "o": lin(D, D), "ln1": ln(D),
                "ff1": lin(D, I), "ff2": lin(I, D), "ln2": ln(D)}

    params = {
        "video_encoder": {
            "proj": lin(Fv, D),
            "pos": jax.random.normal(next(keys), (1, Lv, D), jnp.float32) * std,
            "ln": ln(D),
            "layer": tlayer(),
        },
        "proj_q": {"l1": lin(D, D), "l2": lin(D, D)},
        "emb_dec": {
            "word": jax.random.normal(next(keys), (V, D), jnp.float32) * std,
            "type": jax.random.normal(next(keys), (2, D), jnp.float32) * std,
            "pos": jax.random.normal(next(keys), (1, L, D), jnp.float32) * std,
            "ln": ln(D),
        },
        "decoder": tlayer(),
        "pred_head": {"transform": lin(D, D), "ln": ln(D), "decoder": lin(D, V)},
    }
    # aux (key) branch initialized as copies of the query branch (as in __init__)
    params["video_encoder_aux"] = jax.tree_util.tree_map(lambda x: x,
                                                         params["video_encoder"])
    params["proj_k"] = jax.tree_util.tree_map(lambda x: x, params["proj_q"])
    return params


# ----------------------------------------------------------------------------
if __name__ == "__main__":
    cfg = dict(
        hidden_size=32,
        intermediate_size=64,
        num_attention_heads=4,
        vocab_size=128,
        max_v_len=8,
        max_t_len=8,
        video_feature_size=16,
        initializer_range=0.02,
        momentum_aux_m=0.999,
        loss_aux_weight=0.5,
        loss_main_caption=1.0,
        K=1,
    )

    key = jax.random.PRNGKey(0)
    kp, k1, k2, k3, k4 = jax.random.split(key, 5)
    params = init_params(kp, cfg)
    prepped = prep_all(params)          # one-time weight pad + bf16 cast

    B = 2
    Lv, Lt = cfg["max_v_len"], cfg["max_t_len"]
    L = Lv + Lt

    video_feats = jax.random.normal(k1, (B, Lv, cfg["video_feature_size"]), jnp.float32)
    unmasked_video_feats = jax.random.normal(k2, (B, Lv, cfg["video_feature_size"]),
                                             jnp.float32)
    video_mask = jnp.ones((B, Lv), jnp.float32)
    unmasked_video_mask = jnp.ones((B, Lv), jnp.float32)

    text_ids = jax.random.randint(k3, (B, Lt), 0, cfg["vocab_size"]).astype(jnp.int32)
    input_ids = jnp.concatenate([jnp.zeros((B, Lv), jnp.int32), text_ids], axis=1)
    token_type_ids = jnp.concatenate([jnp.zeros((B, Lv), jnp.int32),
                                      jnp.ones((B, Lt), jnp.int32)], axis=1)
    input_masks = jnp.ones((B, L), jnp.float32)

    text_labels = jax.random.randint(k4, (B, Lt), 0, cfg["vocab_size"]).astype(jnp.int32)
    input_labels = jnp.concatenate([jnp.full((B, Lv), -1, jnp.int32), text_labels],
                                   axis=1)

    loss, prediction_scores_list = reasoner_forward(
        prepped, params, cfg, video_feats, video_mask, unmasked_video_feats,
        unmasked_video_mask, input_ids, token_type_ids, input_masks, input_labels)

    jax.block_until_ready((loss, prediction_scores_list))
    assert prediction_scores_list.shape == (1, B, L, cfg["vocab_size"])
    assert jnp.isfinite(loss)
    print("KERNEL_OK")
</pallas_src>

<mosaic_0001>
module attributes {stable_mosaic.version = 11 : i64} {
  func.func @_linear_kernel(%arg0: i32, %arg1: i32, %arg2: i32, %arg3: memref<8x16xbf16, #tpu.memory_space<vmem>>, %arg4: memref<16x32xbf16, #tpu.memory_space<vmem>>, %arg5: memref<1x32xf32, #tpu.memory_space<vmem>>, %arg6: memref<8x32xbf16, #tpu.memory_space<vmem>>, %arg7: memref<8x32xf32, #tpu.memory_space<vmem>>) attributes {dimension_semantics = [#tpu.dimension_semantics<parallel>, #tpu.dimension_semantics<parallel>, #tpu.dimension_semantics<arbitrary>], iteration_bounds = array<i64: 2, 1, 1>, scalar_prefetch = 0 : i64, scratch_operands = 1 : i64, tpu.core_type = #tpu.core_type<tc>, window_params = [{transform_indices = @transform_0, window_bounds = array<i64: 8, 16>}, {transform_indices = @transform_1, window_bounds = array<i64: 16, 32>}, {transform_indices = @transform_2, window_bounds = array<i64: 1, 32>}, {transform_indices = @transform_3, window_bounds = array<i64: 8, 32>}]} {
    %c0_i32 = arith.constant 0 : i32
    %0 = arith.cmpi eq, %arg2, %c0_i32 : i32
    %1 = arith.extui %0 : i1 to i32
    %c0_i32_0 = arith.constant 0 : i32
    %2 = arith.cmpi ne, %1, %c0_i32_0 : i32
    scf.if %2 {
      %cst_10 = arith.constant 0.000000e+00 : f32
      %12 = vector.broadcast %cst_10 : f32 to vector<8x32xf32>
      %c0_11 = arith.constant 0 : index
      %c0_12 = arith.constant 0 : index
      %13 = vector.load %arg7[%c0_11, %c0_12] : memref<8x32xf32, #tpu.memory_space<vmem>>, vector<8x32xf32>
      tpu.vector_store %arg7[%c0_11, %c0_12], %12 {strides = array<i32>} : memref<8x32xf32, #tpu.memory_space<vmem>>, vector<8x32xf32>,
    } else {
    }
    %c0 = arith.constant 0 : index
    %c0_1 = arith.constant 0 : index
    %3 = vector.load %arg7[%c0, %c0_1] : memref<8x32xf32, #tpu.memory_space<vmem>>, vector<8x32xf32>
    %c0_2 = arith.constant 0 : index
    %c0_3 = arith.constant 0 : index
    %4 = vector.load %arg3[%c0_2, %c0_3] : memref<8x16xbf16, #tpu.memory_space<vmem>>, vector<8x16xbf16>
    %c0_4 = arith.constant 0 : index
    %c0_5 = arith.constant 0 : index
    %5 = vector.load %arg4[%c0_4, %c0_5] : memref<16x32xbf16, #tpu.memory_space<vmem>>, vector<16x32xbf16>
    %cst = arith.constant dense<0.000000e+00> : vector<8x32xf32>
    %6 = tpu.matmul %4, %5, %cst {dimension_numbers = #tpu.dot_dimension_numbers<[1], [0], [0], [1], [0, 0, 1, 1], [], []>} : vector<8x16xbf16>, vector<16x32xbf16>, vector<8x32xf32> -> vector<8x32xf32>
    %7 = arith.addf %3, %6 : vector<8x32xf32>
    %c0_6 = arith.constant 0 : index
    %c0_7 = arith.constant 0 : index
    %8 = vector.load %arg7[%c0_6, %c0_7] : memref<8x32xf32, #tpu.memory_space<vmem>>, vector<8x32xf32>
    tpu.vector_store %arg7[%c0_6, %c0_7], %7 {strides = array<i32>} : memref<8x32xf32, #tpu.memory_space<vmem>>, vector<8x32xf32>,
    %c0_i32_8 = arith.constant 0 : i32
    %9 = arith.cmpi eq, %arg2, %c0_i32_8 : i32
    %10 = arith.extui %9 : i1 to i32
    %c0_i32_9 = arith.constant 0 : i32
    %11 = arith.cmpi ne, %10, %c0_i32_9 : i32
    scf.if %11 {
      %c0_10 = arith.constant 0 : index
      %c0_11 = arith.constant 0 : index
      %12 = vector.load %arg7[%c0_10, %c0_11] : memref<8x32xf32, #tpu.memory_space<vmem>>, vector<8x32xf32>
      %c0_12 = arith.constant 0 : index
      %c0_13 = arith.constant 0 : index
      %13 = vector.load %arg5[%c0_12, %c0_13] : memref<1x32xf32, #tpu.memory_space<vmem>>, vector<1x32xf32>
      %14 = vector.broadcast %13 : vector<1x32xf32> to vector<8x32xf32>
      %15 = arith.addf %12, %14 : vector<8x32xf32>
      %16 = arith.truncf %15 : vector<8x32xf32> to vector<8x32xbf16>
      %c0_14 = arith.constant 0 : index
      %c0_15 = arith.constant 0 : index
      %17 = vector.load %arg6[%c0_14, %c0_15] : memref<8x32xbf16, #tpu.memory_space<vmem>>, vector<8x32xbf16>
      tpu.vector_store %arg6[%c0_14, %c0_15], %16 {strides = array<i32>} : memref<8x32xbf16, #tpu.memory_space<vmem>>, vector<8x32xbf16>,
    } else {
    }
    return
  }
  func.func @transform_0(%arg0: i32, %arg1: i32, %arg2: i32) -> (i32, i32) {
    %c0_i32 = arith.constant 0 : i32
    return %arg0, %arg2 : i32, i32
  }
  func.func @transform_1(%arg0: i32, %arg1: i32, %arg2: i32) -> (i32, i32) {
    %c0_i32 = arith.constant 0 : i32
    return %arg2, %arg1 : i32, i32
  }
  func.func @transform_2(%arg0: i32, %arg1: i32, %arg2: i32) -> (i32, i32) {
    %c0_i32 = arith.constant 0 : i32
    %c0_i32_0 = arith.constant 0 : i32
    return %c0_i32, %arg1 : i32, i32
  }
  func.func @transform_3(%arg0: i32, %arg1: i32, %arg2: i32) -> (i32, i32) {
    %c0_i32 = arith.constant 0 : i32
    return %arg0, %arg1 : i32, i32
  }
}

</mosaic_0001>

<bundles_post_ra>
// kernel: tpu_custom_call.1
= control target key start
LH: loop header
LB: loop body
LE: loop exit
PB: predicated region body
PF: predicated region fallthrough
CT: control target
= control target key end

     0   :  { %8 = vsyncpa [#allocation4], 0  ;;  %s896_s0 = inlined_call_operand.hbm [shape: bf16[16,16], index: 0, kind: input, shape index: {}]   ;;  %s897_s1 = inlined_call_operand.hbm [shape: bf16[16,32], index: 1, kind: input, shape index: {}]   ;;  %s898_s2 = inlined_call_operand.vmem [shape: f32[1,32], index: 2, kind: input, shape index: {}]   ;;  %s899_s3 = inlined_call_operand.hbm [shape: bf16[16,32], index: 3, kind: output, shape index: {}]  }
   0x1   :  { %10 = vsyncpa [#allocation4 + $0x1], 0 }
   0x2   :  { %11 = vsyncpa [#allocation7], 0 }
   0x3   :  { %12 = vsyncpa [#allocation5], 0 }
   0x4   :  { %14 = vsyncpa [#allocation5 + $0x1], 0  ;;  %s726_s12 = smov 0   ;;  %s728_s13 = smov 0  }
   0x5   :  { %s730_s14 = smov 0   ;;  %s732_s15 = smov 0  }
   0x6   :  { %s734_s16 = smov 0   ;;  %s736_s17 = smov 0  }
   0x7 LB: > { %s454_s18 = sadd.s32 4294967295, %s697_s17   ;;  %s455_s19 = sadd.s32 4294967294, %s697_s17   ;;  %s697_s17 = sphi %s736_s17, %s20_s17   ;;  %s693_s16 = sphi %s734_s16, %s917_s16   ;;  %s689_s15 = sphi %s732_s15, %s916_s15   ;;  %s685_s14 = sphi %s730_s14, %s915_s14   ;;  %s681_s13 = sphi %s728_s13, %s914_s13   ;;  %s677_s12 = sphi %s726_s12, %s913_s12  }
   0x8   : > { %p61_p0 = scmp.ne.s32.totalorder %s681_s13, %s677_s12  ;;  %p760_p1 = scmp.eq.s32.totalorder %s454_s18, 0 }
   0x9   : > { %p764_p2 = scmp.eq.s32.totalorder %s454_s18, 1  ;;  %p147_p3 = scmp.eq.s32.totalorder %s455_s19, 1 }
   0xa   : > { %p770_p4 = por %p760_p1, %p61_p0  ;;  %p456_p5 = scmp.ge.s32.totalorder %s697_s17, 1 }
   0xb   : > { %p775_p6 = por %p147_p3, %p61_p0  ;;  %p154_p7 = scmp.lt.s32.totalorder %s697_s17, 3 }
   0xc   : > { %s903_s22 = scalar_select %p770_p4, 1, 0 }
   0xd   : > { %s904_s23 = scalar_select %p775_p6, 1, 0 }
   0xe   : > { %p780_p8 = pnand %p456_p5, %p154_p7  ;;  %s699_s25 = smov [#allocation6]  }
   0xf   : > { %s170_s26 = sshll.u32 %s699_s25, 4  ;;  %s39_s28 = sadd.s32 1, %s693_s16  ;;  %s171_s26 = int_to_ptr.vmem [resolvable:$true] %s170_s26 }
  0x10   : > { %p489_p9 = pneg %p780_p8  ;;  %s570_s29 = scalar_lea.vmem %s171_s26, 128 }
  0x11   : > { %p571_p13 = scmp.ne.s32.totalorder %s171_s26, %s570_s29  ;;  %p578_p5 = scmp.lt.s32.totalorder %s171_s26, %s171_s26 }
  0x12   : > { %p789_p11 = pnand %p489_p9, %p760_p1  ;;  %p579_p7 = scmp.lt.s32.totalorder %s570_s29, %s570_s29 }
  0x14   : > { %p561_p12 = pneg %p789_p11  ;;  %p580_p6 = por %p579_p7, %p578_p5 }
  0x16   : > { %p573_p0 = pnand %p571_p13, %p561_p12 }
  0x18   : > { %p574_p3 = pneg %p573_p0 }
  0x1a   : > { %p581_p4 = pnand %p580_p6, %p574_p3 }
  0x1c   : > { %584 = shalt.err (!%p581_p4)
}
  0x1d   : > { %s700_s30 = smov 64   ;;  %s701_s4 = smov 4  }
  0x1e   : > { %492 = dma.hbm_to_vmem [thread:$0]  (!%p789_p11), %s897_s1, 128, %s171_s26, [#allocation7], %s700_s30, %s700_s30, %s701_s4  }
  0x1f   : > { %p41_p6 = scmp.ge.s32.totalorder %s39_s28, 2  ;;  %s48_s7 = sadd.s32 1, %s685_s14 }
  0x20   : > { %p55_p4 = scmp.ne.s32.totalorder %s685_s14, %s681_s13  ;;  %p56_p9 = scmp.eq.s32.totalorder %s697_s17, 0 }
  0x21   : > { %s919_s28 = smov (%p41_p6, %s39_s28), 0  ;;  %p502_p0 = scmp.lt.s32.totalorder %s697_s17, 2 }
  0x22   : > { %p807_p12 = por %p56_p9, %p55_p4  ;;  %p813_p13 = por %p764_p2, %p55_p4 }
  0x23   : > { %s43_s10 = ssub.s32 %s693_s16, %s919_s28  ;;  %s190_s11 = sand.u32 1, %s685_s14  }
  0x24   : > { %p46_p11 = scmp.eq.s32.totalorder %s43_s10, 0  ;;  %s460_s18 = sshll.u32 %s190_s11, 2 }
  0x25   : > { %s461_s25 = sshll.u32 %s693_s16, 6  ;;  %s194_s30 = scalar_lea.vmem [#allocation3], %s460_s18 }
  0x26   : > { %s822_s19 = scalar_select %p46_p11, %s685_s14, %s48_s7  }
  0x27   : > { %s200_s29 = scalar_lea.hbm %s896_s0, %s461_s25  ;;  %s202_s4 = sshll.u32 %s194_s30, 4  ;;  %s203_s4 = int_to_ptr.vmem [resolvable:$true] %s202_s4 }
  0x28   : > { %p830_p2 = pnand %p502_p0, %p807_p12  ;;  %s191_s5 = scalar_lea.sflag [#allocation4], %s190_s11 }
  0x29   : > { %s598_s6 = scalar_lea.vmem %s203_s4, 64  ;;  %s702_s7 = smov [#allocation3]  }
  0x2a   : > { %p587_p3 = pneg %p830_p2  ;;  %p599_p5 = scmp.ne.s32.totalorder %s203_s4, %s598_s6 }
  0x2b   : > { %s603_s10 = sshll.u32 %s702_s7, 4  ;;  %s604_s10 = int_to_ptr.vmem [resolvable:$false] %s603_s10 }
  0x2c   : > { %p601_p7 = pnand %p599_p5, %p587_p3  ;;  %s605_s25 = scalar_lea.vmem %s604_s10, 128 }
  0x2d   : > { %p606_p4 = scmp.lt.s32.totalorder %s203_s4, %s604_s10  ;;  %p607_p9 = scmp.lt.s32.totalorder %s605_s25, %s598_s6 }
  0x2e   : > { %p602_p6 = pneg %p601_p7 }
  0x2f   : > { %p608_p11 = por %p607_p9, %p606_p4 }
  0x31   : > { %p609_p10 = pnand %p608_p11, %p602_p6 }
  0x33   : > { %612 = shalt.err (!%p609_p10)
}
  0x34   : > { %496 = dma.hbm_to_vmem [thread:$0]  (!%p830_p2), %s200_s29, 64, %s203_s4, %s191_s5  }
  0x35   : > { %211 = sbr.rel (%p780_p8) target bundleno = 286 (0x11e), region = 32  ;;  %s841_s8 = sand.u32 (!%p780_p8), 1, %s681_s13  }
  0x36   : > { %s463_s11 = sshll.u32 (!%p780_p8), %s841_s8, 2  ;;  %s214_s18 = scalar_lea.sflag (!%p780_p8), [#allocation4], %s841_s8 }
  0x37   : > { %s217_s26 = scalar_lea.vmem (!%p780_p8), [#allocation3], %s463_s11  ;;  %p910_p12 = scmp.ne.s32.totalorder (!%p780_p8), %s903_s22, 0 }
  0x3a   : > { %664 = dma.done.wait (%p910_p12), %s214_s18, 64  }
  0x3b   : > { %666 = vsyncadd (%p910_p12), %s214_s18, 4294967232 }
  0x3c   : > { %668 = dma.done.wait (%p760_p1), [#allocation7], 128  }
  0x3d   : > { %670 = vsyncadd (%p760_p1), [#allocation7], 4294967168  ;;  %vm256_vm0 = vcmask 261120   ;;  %v703_v0 = vmov 0.0   ;;  %vm704_vm1 = vmmov 0   ;;  %v558_v1 = vld [vmem:[#allocation6] sm:$0xff]  }
  0x3e   : > { %257 = vst.msk [vmem:[#allocation2] sm:$0xff] %vm256_vm0, %v703_v0  ;;  %475 = vmatprep.subr.bf16.mxu0 %v703_v0  ;;  %477 = vmatprep.mubr.msk.bf16.mxu0 %vm704_vm1, %v703_v0  ;;  %v259_v2 = vld [vmem:[%s217_s26] sm:$0xf]  ;;  %vm268_vm2 = vcmask 130048   ;;  %v468_v9 = vld [vmem:[%s898_s2] ss:$0 sm:$0xff] }
  0x3f   : > { %476 = vmatpush3.bf16.msra.mxu0 %v558_v1  ;;  %s470_s24 = sshll.u32 %s689_s15, 6  ;;  %s246_s27 = scalar_lea.vmem [#allocation8], %s463_s11  ;;  %vm328_vm3 = vcmask 257024  }
  0x40   : > { %s345_s29 = sshll.u32 %s246_s27, 4  ;;  %s343_s21 = scalar_lea.hbm %s899_s3, %s470_s24  ;;  %s346_s29 = int_to_ptr.vmem [resolvable:$true] %s345_s29 }
  0x41   : > { %s331_s5 = scalar_lea.sflag [#allocation5], %s841_s8  ;;  %s613_s6 = scalar_lea.vmem %s346_s29, 64 }
  0x42   : > { %478 = vmatmul.mubr.msk.bf16.vlgmr.msra.gmra.mxu0 %vm268_vm2, %v259_v2  ;;  %p614_p1 = scmp.ne.s32.totalorder %s346_s29, %s613_s6  ;;  %s705_s7 = smov [#allocation8]  }
  0x43   : > { %s617_s10 = sshll.u32 %s705_s7, 4  ;;  %s618_s10 = int_to_ptr.vmem [resolvable:$false] %s617_s10 }
  0x44   : > { %p615_p8 = pnand %p614_p1, %p813_p13  ;;  %s619_s15 = scalar_lea.vmem %s618_s10, 128 }
  0x45   : > { %v258_v3 = vld [vmem:[#allocation2] sm:$0xff]  ;;  %p620_p0 = scmp.lt.s32.totalorder %s346_s29, %s618_s10  ;;  %p621_p2 = scmp.lt.s32.totalorder %s619_s15, %s613_s6 }
  0x46   : > { %p616_p10 = pneg %p615_p8 }
  0x47   : > { %p622_p3 = por %p621_p2, %p620_p0 }
  0x49   : > { %p623_p5 = pnand %p622_p3, %p616_p10 }
 0x102   : > { %v306_v4 = vpop.f32.mrf.mxu0 }
 0x103   : > { %v312_v5 = vadd.f32 %v306_v4, %v258_v3 }
 0x104   : > { %v479_v6 = vpop.f32.mrf.mxu0 }
 0x105   : > { %314 = vst.msk [vmem:[#allocation2] sm:$0xff] %vm256_vm0, %v312_v5 }
 0x106   : > { %v309_v7 = vpop.f32.mrf.mxu0 }
 0x108   : > { %v480_v8 = vpop.f32.mrf.mxu0 }
 0x10c   : > { %v318_v10 = vld [vmem:[#allocation2] sm:$0xff] }
 0x10d   : > { %v326_v11 = vadd.f32 %v468_v9, %v318_v10 }
 0x10f   : > { %v327_v12 = vpack.c.bf16 %v326_v11, %v326_v11 }
 0x111   : > { %329 = vst.msk [vmem:[%s246_s27] sm:$0xf] %vm328_vm3, %v327_v12 }
 0x112   : > { %626 = shalt.err (!%p623_p5)
}
 0x113   : > { %s627_s25 = scalar_lea.hbm %s343_s21, 64  ;;  %s631_s18 = scalar_lea.hbm %s899_s3, 128 }
 0x114   : > { %p628_p7 = scmp.ne.s32.totalorder %s343_s21, %s627_s25  ;;  %p632_p9 = scmp.lt.s32.totalorder %s343_s21, %s899_s3 }
 0x115   : > { %p633_p11 = scmp.lt.s32.totalorder %s631_s18, %s627_s25 }
 0x116   : > { %p629_p6 = pnand %p628_p7, %p813_p13 }
 0x117   : > { %p634_p12 = por %p633_p11, %p632_p9 }
 0x118   : > { %p630_p4 = pneg %p629_p6 }
 0x11a   : > { %p635_p1 = pnand %p634_p12, %p630_p4 }
 0x11c   : > { %638 = shalt.err (!%p635_p1)
}
 0x11d   : > { %487 = dma.vmem_to_hbm [thread:$0]  (%p813_p13), %s346_s29, 64, %s343_s21, %s331_s5  }
 0x11e PF: > { %s357_s22 = sand.u32 1, %s677_s12   ;;  %p911_p8 = scmp.ne.s32.totalorder %s904_s23, 0 }
 0x11f   : > { %p912_p10 = scmp.ge.s32.totalorder %s697_s17, 2  ;;  %s358_s24 = scalar_lea.sflag [#allocation5], %s357_s22 }
 0x121   : > { %p498_p0 = pnand %p912_p10, %p911_p8 }
 0x123   : > { %p499_p2 = pneg %p498_p0 }
 0x125   : > { %672 = dma.done.wait (%p499_p2), %s358_s24, 64  }
 0x126   : > { %674 = vsyncadd (%p499_p2), %s358_s24, 4294967232  ;;  %s20_s17 = sadd.s32 1, %s697_s17   ;;  %s913_s12 = smov %s681_s13 }
 0x127   : > { %p17_p3 = scmp.ge.s32.totalorder %s20_s17, 4   ;;  %s914_s13 = smov %s685_s14 }
 0x128   : > { %s915_s14 = smov %s822_s19  ;;  %s916_s15 = smov %s693_s16 }
 0x129   : > { %s917_s16 = smov %s919_s28  ;;  %19 = sbr.rel (!%p17_p3) target bundleno = 7 (0x7), region = 93 }
 0x12e   :  { %363 = vsyncpa [#allocation4], 1 }
 0x12f   :  { %365 = vsyncpa [#allocation4 + $0x1], 1 }
 0x130   :  { %366 = vsyncpa [#allocation7], 1 }
 0x131   :  { %367 = vsyncpa [#allocation5], 1 }
 0x132   :  { %369 = vsyncpa [#allocation5 + $0x1], 1 }

</bundles_post_ra>
